<compile_context>
chip_gen: v7x
topology: tpu7x:2x2x1
jax: 0.10.0
libtpu: 0.0.40
codegen_flags: <defaults>
</compile_context>

<pallas_src>
import math
import functools

import jax
import jax.numpy as jnp
from jax import lax
from jax.experimental import pallas as pl
from jax.experimental.pallas import tpu as pltpu


# ---------------------------------------------------------------------------
# Kernel 1: pre-LayerNorm + QKV projection
# grid = (B, S//tq, 3H//tn); LN cached in VMEM scratch across the (innermost) n axis
# ---------------------------------------------------------------------------
def _ln_qkv_kernel(x_ref, nw_ref, nb_ref, w_ref, b_ref, qkv_ref, xn_ref, *, eps):
    @pl.when(pl.program_id(2) == 0)
    def _():
        x = x_ref[0].astype(jnp.float32)                       # (tq, H), fp32 LN
        mu = jnp.mean(x, axis=-1, keepdims=True)
        var = jnp.mean(jnp.square(x - mu), axis=-1, keepdims=True)
        xn = (x - mu) * lax.rsqrt(var + eps)
        xn = xn * nw_ref[...] + nb_ref[...]
        xn_ref[...] = xn.astype(xn_ref.dtype)                  # bf16 for the MXU

    # (tq, H) @ (H, tn): weight pre-transposed in the wrapper, fp32 accumulation.
    out = jnp.dot(xn_ref[...], w_ref[...], preferred_element_type=jnp.float32)
    out = out + b_ref[...]                                     # (1, tn) broadcast
    qkv_ref[0] = out.astype(qkv_ref.dtype)


# ---------------------------------------------------------------------------
# Kernel 2: flash attention (all heads batched per step, online softmax over kv tiles)
# grid = (B, S//tq, S//tkv)
# ---------------------------------------------------------------------------
def _flash_attn_kernel(mask_ref, q_ref, k_ref, v_ref, ctx_ref, m_ref, l_ref, acc_ref,
                       *, num_heads, head_dim, bf16_exp, approx_reciprocal):
    kv = pl.program_id(2)

    @pl.when(kv == 0)
    def _():
        m_ref[...] = jnp.full(m_ref.shape, -jnp.inf, m_ref.dtype)
        l_ref[...] = jnp.zeros(l_ref.shape, l_ref.dtype)
        acc_ref[...] = jnp.zeros(acc_ref.shape, acc_ref.dtype)

    tq = q_ref.shape[1]
    tk = k_ref.shape[1]
    # (t, H) -> (heads, t, Dh); the 1/sqrt(Dh) scale is already folded into Q weights.
    qh = q_ref[0].reshape(tq, num_heads, head_dim).transpose(1, 0, 2)
    kh = k_ref[0].reshape(tk, num_heads, head_dim).transpose(1, 0, 2)
    vh = v_ref[0].reshape(tk, num_heads, head_dim).transpose(1, 0, 2)

    s = jnp.einsum("hqd,hkd->hqk", qh, kh,
                   preferred_element_type=jnp.float32)         # (h, tq, tkv) tile only
    s = s + mask_ref[...]                                      # (1, 1, tkv) broadcast

    m_prev = m_ref[...]
    m_new = jnp.maximum(m_prev, jnp.max(s, axis=-1, keepdims=True))
    alpha = jnp.exp(m_prev - m_new)
    shifted = s - m_new                                        # <= 0 everywhere
    if bf16_exp:                                               # bf16 EUP (v6e / v7x)
        p_mm = jnp.exp(shifted.astype(jnp.bfloat16))
        row_sum = jnp.sum(p_mm.astype(jnp.float32), axis=-1, keepdims=True)
    else:                                                      # fp32 EUP (v5e-safe)
        p = jnp.exp(shifted)
        row_sum = jnp.sum(p, axis=-1, keepdims=True)
        p_mm = p.astype(jnp.bfloat16)
    l_ref[...] = alpha * l_ref[...] + row_sum
    acc_ref[...] = alpha * acc_ref[...] + jnp.einsum(
        "hqk,hkd->hqd", p_mm, vh, preferred_element_type=jnp.float32)
    m_ref[...] = m_new

    @pl.when(kv == pl.num_programs(2) - 1)
    def _():
        if approx_reciprocal:
            inv_l = pl.reciprocal(l_ref[...], approx=True)     # EUP slot
        else:
            inv_l = 1.0 / l_ref[...]
        ctx = acc_ref[...] * inv_l                             # (h, tq, Dh)
        ctx = ctx.transpose(1, 0, 2).reshape(tq, num_heads * head_dim)
        ctx_ref[0] = ctx.astype(ctx_ref.dtype)


# ---------------------------------------------------------------------------
# Kernel 3: output projection (ctx @ ow^T), K-tiled with fp32 accumulator
# grid = (B, S//tq, H//tn, H//tk)
# ---------------------------------------------------------------------------
def _out_proj_kernel(ctx_ref, w_ref, out_ref, acc_ref):
    @pl.when(pl.program_id(3) == 0)
    def _():
        acc_ref[...] = jnp.zeros(acc_ref.shape, acc_ref.dtype)
    acc_ref[...] += jnp.dot(ctx_ref[0], w_ref[...], preferred_element_type=jnp.float32)

    @pl.when(pl.program_id(3) == pl.num_programs(3) - 1)
    def _():
        out_ref[0] = acc_ref[...].astype(out_ref.dtype)


def _pick_block(dim, target, granule):
    """Largest size <= target that divides dim and is a multiple of granule, else dim."""
    if dim <= target:
        return dim
    c = (target // granule) * granule
    while c >= granule:
        if dim % c == 0:
            return c
        c -= granule
    return dim


def deepspeed_self_attention(x, input_mask, params, *, num_heads, eps=1e-5,
                             q_block=None, kv_block=None, qkv_n_block=None,
                             out_n_block=None, out_k_block=None,
                             side_dtype=jnp.bfloat16, bf16_exp=False,
                             approx_reciprocal=True):
    """Forward of DeepSpeedSelfAttention (fp path, pre_layer_norm=True, mp_size=1).

    Returns (output, key_layer, value_layer, context_layer). key/value/context are
    emitted in `side_dtype` (bf16 by default to halve HBM writeback); pass
    side_dtype=x.dtype / approx_reciprocal=False / bf16_exp=False for strict parity
    tests against the fp32 DeepSpeed path.
    """
    B, S, H = x.shape
    assert H % num_heads == 0
    Dh = H // num_heads
    H3 = 3 * H

    q_block = q_block or _pick_block(S, 256, 8)
    kv_block = kv_block or _pick_block(S, 512, 128)
    qkv_n_block = qkv_n_block or _pick_block(H3, 512, 128)
    out_n_block = out_n_block or _pick_block(H, 512, 128)
    out_k_block = out_k_block or _pick_block(H, 512, 128)

    assert S % q_block == 0 and (q_block % 8 == 0 or q_block == S)
    assert S % kv_block == 0 and (kv_block % 128 == 0 or kv_block == S)
    assert H3 % qkv_n_block == 0 and (qkv_n_block % 128 == 0 or qkv_n_block == H3)
    assert H % out_n_block == 0 and (out_n_block % 128 == 0 or out_n_block == H)
    assert H % out_k_block == 0 and (out_k_block % 128 == 0 or out_k_block == H)

    wdtype = jnp.bfloat16
    scale = 1.0 / math.sqrt(Dh)       # net DeepSpeed attention scaling

    nw = params["norm_w"].reshape(1, H).astype(jnp.float32)
    nb = params["norm_b"].reshape(1, H).astype(jnp.float32)
    # Fold the softmax scale into the Q rows, then pre-transpose (one-time, wrapper)
    # so the kernels issue plain (S,K)x(K,N) matmuls with no in-kernel relayout.
    qkvw = params["attn_qkvw"]                                  # (3H, H) rows = [Q;K;V]
    qkvw = jnp.concatenate([qkvw[:H] * scale, qkvw[H:]], axis=0)
    qkvw_t = qkvw.T.astype(wdtype)                              # (H, 3H) cols = [Q|K|V]
    qkvb = params["attn_qkvb"]
    qkvb = jnp.concatenate([qkvb[:H] * scale, qkvb[H:]]).reshape(1, H3).astype(jnp.float32)
    ow_t = params["attn_ow"].T.astype(wdtype)                   # (H, H)
    mask = input_mask.reshape(B, 1, S).astype(jnp.float32)      # additive attention mask

    vmem_limit = 48 * 1024 * 1024   # leaves headroom inside v7x's 64 MiB physical VMEM

    n_q = S // q_block
    n_kv = S // kv_block
    n_n = H3 // qkv_n_block
    itemsize = x.dtype.itemsize

    # ---------------- 1) pre-LayerNorm + QKV GEMM ----------------
    qkv = pl.pallas_call(
        functools.partial(_ln_qkv_kernel, eps=eps),
        out_shape=jax.ShapeDtypeStruct((B, S, H3), side_dtype),
        grid_spec=pltpu.PrefetchScalarGridSpec(
            num_scalar_prefetch=0,
            grid=(B, n_q, n_n),
            in_specs=[
                pl.BlockSpec((1, q_block, H), lambda b, si, ni: (b, si, 0)),
                pl.BlockSpec((1, H), lambda b, si, ni: (0, 0)),
                pl.BlockSpec((1, H), lambda b, si, ni: (0, 0)),
                pl.BlockSpec((H, qkv_n_block), lambda b, si, ni: (0, ni)),
                pl.BlockSpec((1, qkv_n_block), lambda b, si, ni: (0, ni)),
            ],
            out_specs=pl.BlockSpec((1, q_block, qkv_n_block),
                                   lambda b, si, ni: (b, si, ni)),
            scratch_shapes=[pltpu.VMEM((q_block, H), jnp.bfloat16)],   # cached LN(x)
        ),
        compiler_params=pltpu.CompilerParams(
            dimension_semantics=("parallel", "parallel", "arbitrary"),
            vmem_limit_bytes=vmem_limit),
        cost_estimate=pl.CostEstimate(
            flops=2 * B * S * H * H3 + 8 * B * S * H,
            transcendentals=B * S,
            bytes_accessed=B * S * H * itemsize + H * H3 * 2 + B * S * H3 * 2),
    )(x, nw, nb, qkvw_t, qkvb)

    # ---------------- 2) flash attention ----------------
    context_layer = pl.pallas_call(
        functools.partial(_flash_attn_kernel, num_heads=num_heads, head_dim=Dh,
                          bf16_exp=bf16_exp, approx_reciprocal=approx_reciprocal),
        out_shape=jax.ShapeDtypeStruct((B, S, H), side_dtype),
        grid_spec=pltpu.PrefetchScalarGridSpec(
            num_scalar_prefetch=0,
            grid=(B, n_q, n_kv),
            in_specs=[
                pl.BlockSpec((1, 1, kv_block), lambda b, qi, ki: (b, 0, ki)),   # mask
                pl.BlockSpec((1, q_block, H), lambda b, qi, ki: (b, qi, 0)),    # Q cols
                pl.BlockSpec((1, kv_block, H), lambda b, qi, ki: (b, ki, 1)),   # K cols
                pl.BlockSpec((1, kv_block, H), lambda b, qi, ki: (b, ki, 2)),   # V cols
            ],
            out_specs=pl.BlockSpec((1, q_block, H), lambda b, qi, ki: (b, qi, 0)),
            scratch_shapes=[
                pltpu.VMEM((num_heads, q_block, 1), jnp.float32),    # running max
                pltpu.VMEM((num_heads, q_block, 1), jnp.float32),    # running sum
                pltpu.VMEM((num_heads, q_block, Dh), jnp.float32),   # output acc
            ],
        ),
        compiler_params=pltpu.CompilerParams(
            dimension_semantics=("parallel", "parallel", "arbitrary"),
            vmem_limit_bytes=vmem_limit),
        cost_estimate=pl.CostEstimate(
            flops=4 * B * num_heads * S * S * Dh,
            transcendentals=B * num_heads * S * S,
            bytes_accessed=3 * B * S * H * 2 + B * S * H * 2 + B * S * 4),
    )(mask, qkv, qkv, qkv)

    # ---------------- 3) output projection ----------------
    n_on = H // out_n_block
    n_ok = H // out_k_block
    output = pl.pallas_call(
        _out_proj_kernel,
        out_shape=jax.ShapeDtypeStruct((B, S, H), x.dtype),
        grid_spec=pltpu.PrefetchScalarGridSpec(
            num_scalar_prefetch=0,
            grid=(B, n_q, n_on, n_ok),
            in_specs=[
                pl.BlockSpec((1, q_block, out_k_block),
                             lambda b, si, ni, ki: (b, si, ki)),
                pl.BlockSpec((out_k_block, out_n_block),
                             lambda b, si, ni, ki: (ki, ni)),
            ],
            out_specs=pl.BlockSpec((1, q_block, out_n_block),
                                   lambda b, si, ni, ki: (b, si, ni)),
            scratch_shapes=[pltpu.VMEM((q_block, out_n_block), jnp.float32)],
        ),
        compiler_params=pltpu.CompilerParams(
            dimension_semantics=("parallel", "parallel", "parallel", "arbitrary"),
            vmem_limit_bytes=vmem_limit),
        cost_estimate=pl.CostEstimate(
            flops=2 * B * S * H * H, transcendentals=0,
            bytes_accessed=B * S * H * 2 + H * H * 2 + B * S * H * itemsize),
    )(context_layer, ow_t)

    key_layer = qkv[:, :, H:2 * H]
    value_layer = qkv[:, :, 2 * H:]
    return output, key_layer, value_layer, context_layer


def _reference(x, input_mask, params, num_heads, eps=1e-5):
    """Pure-JAX fp32 reference reproducing the torch forward semantics."""
    B, S, H = x.shape
    Dh = H // num_heads
    mu = x.mean(-1, keepdims=True)
    var = ((x - mu) ** 2).mean(-1, keepdims=True)
    xn = (x - mu) / jnp.sqrt(var + eps) * params["norm_w"] + params["norm_b"]
    qkv = xn @ params["attn_qkvw"].T + params["attn_qkvb"]
    q, k, v = jnp.split(qkv, 3, axis=-1)
    qh = q.reshape(B, S, num_heads, Dh).transpose(0, 2, 1, 3)
    kh = k.reshape(B, S, num_heads, Dh).transpose(0, 2, 1, 3)
    vh = v.reshape(B, S, num_heads, Dh).transpose(0, 2, 1, 3)
    s = jnp.einsum("bhqd,bhkd->bhqk", qh, kh) / math.sqrt(Dh)
    s = s + input_mask[:, None, None, :]
    p = jax.nn.softmax(s, axis=-1)
    ctx = jnp.einsum("bhqk,bhkd->bhqd", p, vh).transpose(0, 2, 1, 3).reshape(B, S, H)
    out = ctx @ params["attn_ow"].T
    return out, k, v, ctx


if __name__ == "__main__":
    key = jax.random.PRNGKey(0)

    def make_inputs(key, B, S, heads, Dh):
        H = heads * Dh
        ks = jax.random.split(key, 6)
        x = jax.random.normal(ks[0], (B, S, H), jnp.float32)
        # additive attention mask (0 = attend, -1e4 = masked); mask tail of last batch
        input_mask = jnp.zeros((B, S), jnp.float32).at[B - 1, S - 16:].set(-1e4)
        params = dict(
            norm_w=1.0 + 0.02 * jax.random.normal(ks[1], (H,), jnp.float32),
            norm_b=0.02 * jax.random.normal(ks[2], (H,), jnp.float32),
            attn_qkvw=0.05 * jax.random.normal(ks[3], (3 * H, H), jnp.float32),
            attn_qkvb=0.02 * jax.random.normal(ks[4], (3 * H,), jnp.float32),
            attn_ow=0.05 * jax.random.normal(ks[5], (H, H), jnp.float32),
            attn_ob=jnp.zeros((H,), jnp.float32),  # added outside this op by DeepSpeed
        )
        return x, input_mask, params

    names = ("output", "key_layer", "value_layer", "context_layer")
    k1, k2 = jax.random.split(key)

    # Config A: B=2, 4 heads x 32 = H 128, S=128 -> single-tile grids, defaults.
    xA, mA, pA = make_inputs(k1, B=2, S=128, heads=4, Dh=32)
    outsA = jax.block_until_ready(deepspeed_self_attention(xA, mA, pA, num_heads=4))
    refsA = _reference(xA, mA, pA, num_heads=4)
    for name, a, b in zip(names, outsA, refsA):
        assert a.shape == b.shape, (name, a.shape, b.shape)
        a32 = a.astype(jnp.float32)
        assert jnp.allclose(a32, b, atol=3e-2, rtol=3e-2), (name, float(jnp.abs(a32 - b).max()))

    # Config B: B=1, 8 heads x 32 = H 256, S=256 with forced 128-wide tiles so the
    # flash kv loop, the QKV n-tile loop and the out-proj K accumulation all take
    # multiple steps; also exercises the bf16-exp softmax path (v6e/v7x EUP).
    xB, mB, pB = make_inputs(k2, B=1, S=256, heads=8, Dh=32)
    outsB = jax.block_until_ready(deepspeed_self_attention(
        xB, mB, pB, num_heads=8, q_block=128, kv_block=128, qkv_n_block=128,
        out_n_block=128, out_k_block=128, bf16_exp=True))
    refsB = _reference(xB, mB, pB, num_heads=8)
    for name, a, b in zip(names, outsB, refsB):
        assert a.shape == b.shape, (name, a.shape, b.shape)
        a32 = a.astype(jnp.float32)
        assert jnp.allclose(a32, b, atol=3e-2, rtol=3e-2), (name, float(jnp.abs(a32 - b).max()))

    print("KERNEL_OK")
</pallas_src>

<mosaic_0001>
module attributes {stable_mosaic.version = 11 : i64} {
  func.func @_ln_qkv_kernel(%arg0: i32, %arg1: i32, %arg2: i32, %arg3: memref<1x128x128xf32, #tpu.memory_space<vmem>>, %arg4: memref<1x128xf32, #tpu.memory_space<vmem>>, %arg5: memref<1x128xf32, #tpu.memory_space<vmem>>, %arg6: memref<128x384xbf16, #tpu.memory_space<vmem>>, %arg7: memref<1x384xf32, #tpu.memory_space<vmem>>, %arg8: memref<1x128x384xbf16, #tpu.memory_space<vmem>>, %arg9: memref<128x128xbf16, #tpu.memory_space<vmem>>) attributes {dimension_semantics = [#tpu.dimension_semantics<parallel>, #tpu.dimension_semantics<parallel>, #tpu.dimension_semantics<arbitrary>], iteration_bounds = array<i64: 2, 1, 1>, scalar_prefetch = 0 : i64, scratch_operands = 1 : i64, tpu.core_type = #tpu.core_type<tc>, window_params = [{transform_indices = @transform_0, window_bounds = array<i64: 1, 128, 128>}, {pipeline_mode = #tpu.pipeline_mode<synchronous>, transform_indices = @transform_1, window_bounds = array<i64: 1, 128>}, {pipeline_mode = #tpu.pipeline_mode<synchronous>, transform_indices = @transform_2, window_bounds = array<i64: 1, 128>}, {transform_indices = @transform_3, window_bounds = array<i64: 128, 384>}, {transform_indices = @transform_4, window_bounds = array<i64: 1, 384>}, {transform_indices = @transform_5, window_bounds = array<i64: 1, 128, 384>}]} {
    %c0_i32 = arith.constant 0 : i32
    %0 = arith.cmpi eq, %arg2, %c0_i32 : i32
    %1 = arith.extui %0 : i1 to i32
    %c0_i32_0 = arith.constant 0 : i32
    %2 = arith.cmpi ne, %1, %c0_i32_0 : i32
    scf.if %2 {
      %c0_9 = arith.constant 0 : index
      %c0_10 = arith.constant 0 : index
      %c0_11 = arith.constant 0 : index
      %13 = vector.load %arg3[%c0_9, %c0_10, %c0_11] : memref<1x128x128xf32, #tpu.memory_space<vmem>>, vector<1x128x128xf32>
      %14 = vector.shape_cast %13 : vector<1x128x128xf32> to vector<128x128xf32>
      %cst_12 = arith.constant dense<0.000000e+00> : vector<128xf32>
      %15 = vector.multi_reduction <add>, %14, %cst_12 [1] : vector<128x128xf32> to vector<128xf32>
      %16 = vector.shape_cast %15 : vector<128xf32> to vector<128x1xf32>
      %cst_13 = arith.constant 1.280000e+02 : f32
      %17 = vector.broadcast %cst_13 : f32 to vector<128x1xf32>
      %18 = arith.divf %16, %17 : vector<128x1xf32>
      %19 = vector.broadcast %18 : vector<128x1xf32> to vector<128x128xf32>
      %20 = arith.subf %14, %19 : vector<128x128xf32>
      %21 = arith.mulf %20, %20 : vector<128x128xf32>
      %cst_14 = arith.constant dense<0.000000e+00> : vector<128xf32>
      %22 = vector.multi_reduction <add>, %21, %cst_14 [1] : vector<128x128xf32> to vector<128xf32>
      %23 = vector.shape_cast %22 : vector<128xf32> to vector<128x1xf32>
      %cst_15 = arith.constant 1.280000e+02 : f32
      %24 = vector.broadcast %cst_15 : f32 to vector<128x1xf32>
      %25 = arith.divf %23, %24 : vector<128x1xf32>
      %26 = vector.broadcast %18 : vector<128x1xf32> to vector<128x128xf32>
      %27 = arith.subf %14, %26 : vector<128x128xf32>
      %cst_16 = arith.constant 9.99999974E-6 : f32
      %28 = vector.broadcast %cst_16 : f32 to vector<128x1xf32>
      %29 = arith.addf %25, %28 : vector<128x1xf32>
      %30 = math.rsqrt %29 : vector<128x1xf32>
      %31 = vector.broadcast %30 : vector<128x1xf32> to vector<128x128xf32>
      %32 = arith.mulf %27, %31 : vector<128x128xf32>
      %c0_17 = arith.constant 0 : index
      %c0_18 = arith.constant 0 : index
      %33 = vector.load %arg4[%c0_17, %c0_18] : memref<1x128xf32, #tpu.memory_space<vmem>>, vector<1x128xf32>
      %34 = vector.broadcast %33 : vector<1x128xf32> to vector<128x128xf32>
      %35 = arith.mulf %32, %34 : vector<128x128xf32>
      %c0_19 = arith.constant 0 : index
      %c0_20 = arith.constant 0 : index
      %36 = vector.load %arg5[%c0_19, %c0_20] : memref<1x128xf32, #tpu.memory_space<vmem>>, vector<1x128xf32>
      %37 = vector.broadcast %36 : vector<1x128xf32> to vector<128x128xf32>
      %38 = arith.addf %35, %37 : vector<128x128xf32>
      %39 = arith.truncf %38 : vector<128x128xf32> to vector<128x128xbf16>
      %c0_21 = arith.constant 0 : index
      %c0_22 = arith.constant 0 : index
      %40 = vector.load %arg9[%c0_21, %c0_22] : memref<128x128xbf16, #tpu.memory_space<vmem>>, vector<128x128xbf16>
      tpu.vector_store %arg9[%c0_21, %c0_22], %39 {strides = array<i32>} : memref<128x128xbf16, #tpu.memory_space<vmem>>, vector<128x128xbf16>,
    } else {
    }
    %c0 = arith.constant 0 : index
    %c0_1 = arith.constant 0 : index
    %3 = vector.load %arg9[%c0, %c0_1] : memref<128x128xbf16, #tpu.memory_space<vmem>>, vector<128x128xbf16>
    %c0_2 = arith.constant 0 : index
    %c0_3 = arith.constant 0 : index
    %4 = vector.load %arg6[%c0_2, %c0_3] : memref<128x384xbf16, #tpu.memory_space<vmem>>, vector<128x384xbf16>
    %cst = arith.constant dense<0.000000e+00> : vector<128x384xf32>
    %5 = tpu.matmul %3, %4, %cst {dimension_numbers = #tpu.dot_dimension_numbers<[1], [0], [0], [1], [0, 0, 1, 1], [], []>} : vector<128x128xbf16>, vector<128x384xbf16>, vector<128x384xf32> -> vector<128x384xf32>
    %c0_4 = arith.constant 0 : index
    %c0_5 = arith.constant 0 : index
    %6 = vector.load %arg7[%c0_4, %c0_5] : memref<1x384xf32, #tpu.memory_space<vmem>>, vector<1x384xf32>
    %7 = vector.broadcast %6 : vector<1x384xf32> to vector<128x384xf32>
    %8 = arith.addf %5, %7 : vector<128x384xf32>
    %9 = arith.truncf %8 : vector<128x384xf32> to vector<128x384xbf16>
    %c0_6 = arith.constant 0 : index
    %c0_7 = arith.constant 0 : index
    %c0_8 = arith.constant 0 : index
    %10 = vector.load %arg8[%c0_6, %c0_7, %c0_8] : memref<1x128x384xbf16, #tpu.memory_space<vmem>>, vector<1x128x384xbf16>
    %11 = vector.shape_cast %10 : vector<1x128x384xbf16> to vector<128x384xbf16>
    %12 = vector.shape_cast %9 : vector<128x384xbf16> to vector<1x128x384xbf16>
    tpu.vector_store %arg8[%c0_6, %c0_7, %c0_8], %12 {strides = array<i32>} : memref<1x128x384xbf16, #tpu.memory_space<vmem>>, vector<1x128x384xbf16>,
    return
  }
  func.func @transform_0(%arg0: i32, %arg1: i32, %arg2: i32) -> (i32, i32, i32) {
    %c0_i32 = arith.constant 0 : i32
    %c0_i32_0 = arith.constant 0 : i32
    return %arg0, %arg1, %c0_i32 : i32, i32, i32
  }
  func.func @transform_1(%arg0: i32, %arg1: i32, %arg2: i32) -> (i32, i32) {
    %c0_i32 = arith.constant 0 : i32
    %c0_i32_0 = arith.constant 0 : i32
    %c0_i32_1 = arith.constant 0 : i32
    return %c0_i32, %c0_i32_0 : i32, i32
  }
  func.func @transform_2(%arg0: i32, %arg1: i32, %arg2: i32) -> (i32, i32) {
    %c0_i32 = arith.constant 0 : i32
    %c0_i32_0 = arith.constant 0 : i32
    %c0_i32_1 = arith.constant 0 : i32
    return %c0_i32, %c0_i32_0 : i32, i32
  }
  func.func @transform_3(%arg0: i32, %arg1: i32, %arg2: i32) -> (i32, i32) {
    %c0_i32 = arith.constant 0 : i32
    %c0_i32_0 = arith.constant 0 : i32
    return %c0_i32, %arg2 : i32, i32
  }
  func.func @transform_4(%arg0: i32, %arg1: i32, %arg2: i32) -> (i32, i32) {
    %c0_i32 = arith.constant 0 : i32
    %c0_i32_0 = arith.constant 0 : i32
    return %c0_i32, %arg2 : i32, i32
  }
  func.func @transform_5(%arg0: i32, %arg1: i32, %arg2: i32) -> (i32, i32, i32) {
    %c0_i32 = arith.constant 0 : i32
    return %arg0, %arg1, %arg2 : i32, i32, i32
  }
}

</mosaic_0001>

<bundles_post_ra>
// kernel: tpu_custom_call.1
= control target key start
LH: loop header
LB: loop body
LE: loop exit
PB: predicated region body
PF: predicated region fallthrough
CT: control target
= control target key end

     0   :  { %10 = vsyncpa [#allocation4], 0  ;;  %s2280_s0 = inlined_call_operand.hbm [shape: f32[2,128,128], index: 0, kind: input, shape index: {}]   ;;  %s2281_s1 = inlined_call_operand.vmem [shape: f32[1,128], index: 1, kind: input, shape index: {}]   ;;  %s2282_s2 = inlined_call_operand.vmem [shape: f32[1,128], index: 2, kind: input, shape index: {}]   ;;  %s2283_s3 = inlined_call_operand.hbm [shape: bf16[128,384], index: 3, kind: input, shape index: {}]   ;;  %s2284_s4 = inlined_call_operand.vmem [shape: f32[1,384], index: 4, kind: input, shape index: {}]   ;;  %s2285_s5 = inlined_call_operand.hbm [shape: bf16[2,128,384], index: 5, kind: output, shape index: {}]  }
   0x1   :  { %12 = vsyncpa [#allocation4 + $0x1], 0 }
   0x2   :  { %13 = vsyncpa [#allocation7], 0 }
   0x3   :  { %14 = vsyncpa [#allocation5], 0 }
   0x4   :  { %16 = vsyncpa [#allocation5 + $0x1], 0  ;;  %s1784_s18 = smov 0   ;;  %s1786_s19 = smov 0  }
   0x5   :  { %s1788_s20 = smov 0   ;;  %s1790_s21 = smov 0  }
   0x6   :  { %s1792_s22 = smov 0   ;;  %s1794_s23 = smov 0  }
   0x7 LB: > { %s1298_s24 = sadd.s32 4294967295, %s1742_s23   ;;  %s1299_s25 = sadd.s32 4294967294, %s1742_s23   ;;  %s1742_s23 = sphi %s1794_s23, %s22_s23   ;;  %s1738_s22 = sphi %s1792_s22, %s2309_s22   ;;  %s1734_s21 = sphi %s1790_s21, %s2308_s21   ;;  %s1730_s20 = sphi %s1788_s20, %s2307_s20   ;;  %s1726_s19 = sphi %s1786_s19, %s2306_s19   ;;  %s1722_s18 = sphi %s1784_s18, %s2305_s18  }
   0x8   : > { %p63_p0 = scmp.ne.s32.totalorder %s1726_s19, %s1722_s18  ;;  %p1818_p1 = scmp.eq.s32.totalorder %s1298_s24, 0 }
   0x9   : > { %p1822_p2 = scmp.eq.s32.totalorder %s1298_s24, 1  ;;  %p191_p3 = scmp.eq.s32.totalorder %s1299_s25, 1 }
   0xa   : > { %s2290_s26 = scalar_select %p1818_p1, 1, 0 }
   0xb   : > { %s2291_s27 = scalar_select %p1822_p2, 1, 0 }
   0xc   : > { %p1828_p4 = por %p1818_p1, %p63_p0  ;;  %p1300_p5 = scmp.ge.s32.totalorder %s1742_s23, 1 }
   0xd   : > { %p1833_p6 = por %p191_p3, %p63_p0  ;;  %p198_p7 = scmp.lt.s32.totalorder %s1742_s23, 3 }
   0xe   : > { %s2292_s28 = scalar_select %p1828_p4, 1, 0 }
   0xf   : > { %s2293_s29 = scalar_select %p1833_p6, 1, 0 }
  0x10   : > { %p1838_p8 = pnand %p1300_p5, %p198_p7  ;;  %s1744_s6 = smov [#allocation6]  }
  0x11   : > { %s219_s7 = sshll.u32 %s1744_s6, 4  ;;  %s41_s9 = sadd.s32 1, %s1738_s22  ;;  %s220_s7 = int_to_ptr.vmem [resolvable:$true] %s219_s7 }
  0x12   : > { %s2294_s30 = scalar_select %p1838_p8, 1, 0 }
  0x13   : > { %p1462_p9 = pneg %p1838_p8  ;;  %s1598_s12 = scalar_lea.hbm %s2283_s3, 3072 }
  0x14   : > { %p1599_p12 = scmp.ne.s32.totalorder %s2283_s3, %s1598_s12  ;;  %p1605_p5 = scmp.lt.u32.totalorder %s1598_s12, %s2283_s3 }
  0x15   : > { %p1847_p11 = pnand %p1462_p9, %p1818_p1 }
  0x17   : > { %p1600_p13 = pneg %p1847_p11 }
  0x19   : > { %p1601_p0 = pnand %p1600_p13, %p1599_p12 }
  0x1b   : > { %p1602_p3 = pneg %p1601_p0 }
  0x1d   : > { %p1607_p7 = pnand %p1605_p5, %p1602_p3 }
  0x1f   : > { %1610 = shalt.err (!%p1607_p7)
}
  0x20   : > { %s1611_s17 = scalar_lea.vmem %s220_s7, 3072  ;;  %p1619_p1 = scmp.lt.s32.totalorder %s220_s7, %s220_s7 }
  0x21   : > { %p1612_p9 = scmp.ne.s32.totalorder %s220_s7, %s1611_s17  ;;  %p1620_p4 = scmp.lt.s32.totalorder %s1611_s17, %s1611_s17 }
  0x23   : > { %p1614_p10 = pnand %p1612_p9, %p1600_p13  ;;  %p1621_p8 = por %p1620_p4, %p1619_p1 }
  0x25   : > { %p1615_p6 = pneg %p1614_p10 }
  0x27   : > { %p1622_p2 = pnand %p1621_p8, %p1615_p6 }
  0x29   : > { %1625 = shalt.err (!%p1622_p2)
}
  0x2a   : > { %s1745_s24 = smov 192   ;;  %s1746_s25 = smov 12  }
  0x2b   : > { %1465 = dma.hbm_to_vmem [thread:$0]  (!%p1847_p11), %s2283_s3, 3072, %s220_s7, [#allocation7], %s1745_s24, %s1745_s24, %s1746_s25  }
  0x2c   : > { %p43_p1 = scmp.ge.s32.totalorder %s41_s9, 2  ;;  %s50_s11 = sadd.s32 1, %s1730_s20 }
  0x2d   : > { %p57_p2 = scmp.ne.s32.totalorder %s1730_s20, %s1726_s19  ;;  %p58_p4 = scmp.eq.s32.totalorder %s1742_s23, 0 }
  0x2e   : > { %s2311_s9 = smov (%p43_p1, %s41_s9), 0  ;;  %p2297_p8 = scmp.ne.s32.totalorder %s2291_s27, 0 }
  0x2f   : > { %p1874_p6 = por %p58_p4, %p57_p2  ;;  %s45_s8 = ssub.s32 %s1738_s22, %s2311_s9 }
  0x30   : > { %p1880_p10 = por %p2297_p8, %p57_p2  ;;  %p1475_p12 = scmp.lt.s32.totalorder %s1742_s23, 2 }
  0x31   : > { %p48_p11 = scmp.eq.s32.totalorder %s45_s8, 0  ;;  %s241_s7 = sand.u32 1, %s1730_s20  }
  0x32   : > { %s1304_s14 = sshll.u32 %s241_s7, 7  ;;  %s1371_s16 = sshll.u32 %s1738_s22, 11 }
  0x33   : > { %s1889_s15 = scalar_select %p48_p11, %s1730_s20, %s50_s11  }
  0x34   : > { %s1895_s25 = scalar_lea.hbm %s2280_s0, %s1371_s16  ;;  %s245_s27 = scalar_lea.vmem [#allocation3], %s1304_s14 }
  0x35   : > { %s254_s6 = sshll.u32 %s245_s27, 4  ;;  %p1901_p13 = pnand %p1475_p12, %p1874_p6  ;;  %s1897_s6 = int_to_ptr.vmem [resolvable:$true] %s254_s6 }
  0x36   : > { %s1905_s11 = scalar_lea.sflag [#allocation4], %s241_s7  ;;  %s1626_s8 = scalar_lea.hbm %s1895_s25, 2048 }
  0x37   : > { %p1627_p0 = scmp.ne.s32.totalorder %s1895_s25, %s1626_s8  ;;  %p1628_p3 = pneg %p1901_p13 }
  0x38   : > { %s1631_s12 = scalar_lea.hbm %s2280_s0, 4096  ;;  %p1632_p9 = scmp.lt.u32.totalorder %s1895_s25, %s2280_s0 }
  0x39   : > { %p1629_p5 = pnand %p1628_p3, %p1627_p0  ;;  %p1633_p1 = scmp.lt.u32.totalorder %s1631_s12, %s1626_s8 }
  0x3a   : > { %p1635_p4 = scmp.lt.u32.totalorder %s1626_s8, %s1895_s25 }
  0x3b   : > { %p1630_p7 = pneg %p1629_p5  ;;  %p1634_p2 = por %p1633_p1, %p1632_p9 }
  0x3d   : > { %p1636_p6 = por %p1635_p4, %p1634_p2 }
  0x3f   : > { %p1637_p8 = pnand %p1636_p6, %p1630_p7 }
  0x41   : > { %1640 = shalt.err (!%p1637_p8)
}
  0x42   : > { %s1641_s7 = scalar_lea.vmem %s1897_s6, 2048  ;;  %s1747_s27 = smov [#allocation3]  }
  0x43   : > { %p1642_p12 = scmp.ne.s32.totalorder %s1897_s6, %s1641_s7  ;;  %s1646_s14 = sshll.u32 %s1747_s27, 4  ;;  %s1647_s14 = int_to_ptr.vmem [resolvable:$false] %s1646_s14 }
  0x44   : > { %s1648_s16 = scalar_lea.vmem %s1647_s14, 4096  ;;  %p1649_p5 = scmp.lt.s32.totalorder %s1897_s6, %s1647_s14 }
  0x45   : > { %p1644_p11 = pnand %p1642_p12, %p1628_p3  ;;  %p1650_p9 = scmp.lt.s32.totalorder %s1648_s16, %s1641_s7 }
  0x47   : > { %p1645_p0 = pneg %p1644_p11  ;;  %p1651_p1 = por %p1650_p9, %p1649_p5 }
  0x49   : > { %p1652_p2 = pnand %p1651_p1, %p1645_p0 }
  0x4b   : > { %1655 = shalt.err (!%p1652_p2)
}
  0x4c   : > { %s1748_s8 = smov 128   ;;  %s1749_s12 = smov 8  }
  0x4d   : > { %1469 = dma.hbm_to_vmem [thread:$0]  (!%p1901_p13), %s1895_s25, 2048, %s1897_s6, %s1905_s11, %s1748_s8, %s1748_s8, %s1749_s12  }
  0x4e   : > { %p2300_p3 = scmp.ne.s32.totalorder %s2294_s30, 0 }
  0x4f   : > { %s1936_s17 = sand.u32 (!%p2300_p3), 1, %s1726_s19   ;;  %p2301_p7 = scmp.ne.s32.totalorder (!%p2300_p3), %s2292_s28, 0 }
  0x50   : > { %266 = sbr.rel (%p2300_p3) target bundleno = 699 (0x2bb), region = 40  ;;  %s1308_s24 = sshll.u32 (!%p2300_p3), %s1936_s17, 7 }
  0x51   : > { %s269_s7 = scalar_lea.sflag (!%p2300_p3), [#allocation4], %s1936_s17  ;;  %s1940_s27 = scalar_lea.vmem (!%p2300_p3), [#allocation3], %s1308_s24 }
  0x57   : > { %1709 = dma.done.wait (%p2301_p7), %s269_s7, 2048  }
  0x58   : > { %1711 = vsyncadd (%p2301_p7), %s269_s7, 4294965248  ;;  %p2302_p13 = scmp.ne.s32.totalorder %s2290_s26, 0 }
  0x5a   : > { %1713 = dma.done.wait (%p2302_p13), [#allocation7], 3072  }
  0x5b   : > { %1715 = vsyncadd (%p2302_p13), [#allocation7], 4294964224  ;;  %v321_v0 = vld [vmem:[%s1940_s27] sm:$0xff]  ;;  %v323_v1 = vld [vmem:[%s1940_s27 + $0x10] sm:$0xff]  ;;  %s1452_s11 = smul.u32 192, %s1936_s17  ;;  %s1751_s26 = smov [#allocation8]  }
  0x5c   : > { %337 = vadd.xlane.f32.xlu0 %v321_v0  ;;  %341 = vadd.xlane.f32.xlu1 %v323_v1  ;;  %v322_v2 = vld [vmem:[%s1940_s27 + $0x8] sm:$0xff]  ;;  %v324_v3 = vld [vmem:[%s1940_s27 + $0x18] sm:$0xff]  ;;  %v325_v4 = vld [vmem:[%s1940_s27 + $0x20] sm:$0xff]  ;;  %s1453_s16 = smul.u32 3072, %s1734_s21  ;;  %s1164_s21 = scalar_lea.sflag [#allocation5], %s1936_s17 }
  0x5d   : > { %v326_v5 = vld [vmem:[%s1940_s27 + $0x28] sm:$0xff]  ;;  %v327_v6 = vld [vmem:[%s1940_s27 + $0x30] sm:$0xff]  ;;  %v1958_v7 = vld [vmem:[%s1940_s27 + $0x38] sm:$0xff]  ;;  %s2147_s14 = scalar_lea.vmem [#allocation8], %s1452_s11  ;;  %s1660_s28 = sshll.u32 %s1751_s26, 4  ;;  %s1661_s28 = int_to_ptr.vmem [resolvable:$false] %s1660_s28 }
  0x5e   : > { %v1961_v8 = vld [vmem:[%s1940_s27 + $0x40] sm:$0xff]  ;;  %v1964_v9 = vld [vmem:[%s1940_s27 + $0x48] sm:$0xff]  ;;  %v1970_v10 = vld [vmem:[%s1940_s27 + $0x50] sm:$0xff]  ;;  %s1182_s8 = sshll.u32 %s2147_s14, 4  ;;  %s2227_s7 = scalar_lea.hbm %s2285_s5, %s1453_s16  ;;  %s2230_s8 = int_to_ptr.vmem [resolvable:$true] %s1182_s8 }
  0x5f   : > { %v1973_v11 = vld [vmem:[%s1940_s27 + $0x58] sm:$0xff]  ;;  %v1978_v12 = vld [vmem:[%s1940_s27 + $0x60] sm:$0xff]  ;;  %v1981_v13 = vld [vmem:[%s1940_s27 + $0x68] sm:$0xff]  ;;  %s1662_s30 = scalar_lea.vmem %s1661_s28, 6144  ;;  %p1663_p12 = scmp.lt.s32.totalorder %s2230_s8, %s1661_s28 }
  0x60   : > { %339 = vadd.xlane.f32.xlu0 %v322_v2  ;;  %343 = vadd.xlane.f32.xlu1 %v324_v3  ;;  %v1986_v14 = vld [vmem:[%s1940_s27 + $0x70] sm:$0xff]  ;;  %v1989_v15 = vld [vmem:[%s1940_s27 + $0x78] sm:$0xff]  ;;  %v1536_v17 = vld [vmem:[#allocation6] ss:$12 sps:$4 sm:$0xff]   ;;  %s1656_s27 = scalar_lea.vmem %s2230_s8, 3072 }
  0x61   : > { %v1534_v16 = vld [vmem:[#allocation6 + $0x4] ss:$12 sps:$4 sm:$0xff]   ;;  %v1537_v18 = vld [vmem:[#allocation6 + $0x1c] ss:$12 sps:$4 sm:$0xff]   ;;  %p1657_p4 = scmp.ne.s32.totalorder %s2230_s8, %s1656_s27  ;;  %p1664_p11 = scmp.lt.s32.totalorder %s1662_s30, %s1656_s27 }
  0x62   : > { %v1539_v19 = vld [vmem:[#allocation6 + $0x8] ss:$12 sps:$4 sm:$0xff]   ;;  %761 = vmatprep.subr.bf16.mxu0 %v1534_v16  ;;  %v1540_v58 = vld [vmem:[#allocation6 + $0x18] ss:$12 sps:$4 sm:$0xff]  }
  0x63   : > { %762 = vmatpush1.bf16.msra.mxu0 %v1536_v17  ;;  %1420 = vmatprep.subr.bf16.mxu1 %v1539_v19  ;;  %p1658_p6 = pnand %p1657_p4, %p1880_p10  ;;  %p1665_p0 = por %p1664_p11, %p1663_p12 }
  0x64   : > { %345 = vadd.xlane.f32.xlu0 %v325_v4  ;;  %347 = vadd.xlane.f32.xlu1 %v326_v5 }
  0x65   : > { %763 = vmatprep.subr.bf16.mxu0 %v1537_v18  ;;  %1421 = vmatpush3.bf16.msra.mxu1 %v1539_v19  ;;  %v1545_v18 = vld [vmem:[#allocation6 + $0x4c] ss:$12 sps:$4 sm:$0xff]   ;;  %p1659_p8 = pneg %p1658_p6 }
  0x66   : > { %v1547_v19 = vld [vmem:[#allocation6 + $0x38] ss:$12 sps:$4 sm:$0xff]  }
  0x67   : > { %764 = vmatpush1.bf16.msra.mxu0 %v1540_v58  ;;  %p1666_p5 = pnand %p1665_p0, %p1659_p8 }
  0x68   : > { %349 = vadd.xlane.f32.xlu0 %v327_v6  ;;  %351 = vadd.xlane.f32.xlu1 %v1958_v7 }
  0x6c   : > { %353 = vadd.xlane.f32.xlu0 %v1961_v8  ;;  %355 = vadd.xlane.f32.xlu1 %v1964_v9 }
  0x70   : > { %357 = vadd.xlane.f32.xlu0 %v1970_v10  ;;  %359 = vadd.xlane.f32.xlu1 %v1973_v11 }
  0x74   : > { %361 = vadd.xlane.f32.xlu0 %v1978_v12  ;;  %363 = vadd.xlane.f32.xlu1 %v1981_v13 }
  0x78   : > { %365 = vadd.xlane.f32.xlu0 %v1986_v14  ;;  %367 = vadd.xlane.f32.xlu1 %v1989_v15 }
  0xe9   : > { %v338_v20 = vpop.xlane.xlu0 %337  ;;  %v342_v21 = vpop.xlane.xlu1 %341 }
  0xea   : > { %v370_v22 = vmul.f32 0.0078125, %v338_v20  ;;  %v372_v23 = vmul.f32 0.0078125, %v342_v21 }
  0xec   : > { %v1993_v24 = vsub.f32 %v321_v0, %v370_v22  ;;  %v1995_v25 = vsub.f32 %v323_v1, %v372_v23  ;;  %v1541_v0 = vld [vmem:[#allocation6 + $0x34] ss:$12 sps:$4 sm:$0xff]  }
  0xed   : > { %v340_v26 = vpop.xlane.xlu0 %339  ;;  %v344_v27 = vpop.xlane.xlu1 %343  ;;  %v1543_v1 = vld [vmem:[#allocation6 + $0x20] ss:$12 sps:$4 sm:$0xff]   ;;  %765 = vmatprep.subr.bf16.mxu0 %v1541_v0  ;;  %v1548_v22 = vld [vmem:[#allocation6 + $0x48] ss:$12 sps:$4 sm:$0xff]  }
  0xee   : > { %v371_v28 = vmul.f32 0.0078125, %v340_v26  ;;  %v402_v29 = vmul.f32 %v1993_v24, %v1993_v24  ;;  %v373_v30 = vmul.f32 0.0078125, %v344_v27  ;;  %v404_v33 = vmul.f32 %v1995_v25, %v1995_v25  ;;  %1422 = vmatprep.subr.bf16.mxu1 %v1543_v1 }
  0xef   : > { %1423 = vmatpush3.bf16.msra.mxu1 %v1543_v1 }
  0xf0   : > { %v1999_v31 = vsub.f32 %v322_v2, %v371_v28  ;;  %418 = vadd.xlane.f32.xlu0 %v402_v29  ;;  %v2001_v32 = vsub.f32 %v324_v3, %v373_v30  ;;  %1424 = vmatprep.subr.bf16.mxu1 %v1547_v19  ;;  %v1549_v29 = vld [vmem:[#allocation6 + $0x64] ss:$12 sps:$4 sm:$0xff]  }
  0xf1   : > { %v346_v34 = vpop.xlane.xlu0 %345  ;;  %v348_v35 = vpop.xlane.xlu1 %347  ;;  %v1551_v30 = vld [vmem:[#allocation6 + $0x50] ss:$12 sps:$4 sm:$0xff]  }
  0xf2   : > { %v374_v36 = vmul.f32 0.0078125, %v346_v34  ;;  %v403_v37 = vmul.f32 %v1999_v31, %v1999_v31  ;;  %v375_v38 = vmul.f32 0.0078125, %v348_v35  ;;  %v405_v41 = vmul.f32 %v2001_v32, %v2001_v32  ;;  %v1555_v35 = vld [vmem:[#allocation6 + $0x68] ss:$12 sps:$4 sm:$0xff]  }
  0xf3   : > { %1425 = vmatpush3.bf16.msra.mxu1 %v1547_v19 }
  0xf4   : > { %v2007_v39 = vsub.f32 %v325_v4, %v374_v36  ;;  %422 = vadd.xlane.f32.xlu0 %v404_v33  ;;  %420 = vadd.xlane.f32.xlu1 %v403_v37  ;;  %v2009_v40 = vsub.f32 %v326_v5, %v375_v38  ;;  %v1552_v33 = vld [vmem:[#allocation6 + $0x60] ss:$12 sps:$4 sm:$0xff]   ;;  %v1556_v36 = vld [vmem:[#allocation6 + $0x78] ss:$12 sps:$4 sm:$0xff]  }
  0xf5   : > { %v350_v42 = vpop.xlane.xlu0 %349  ;;  %v352_v43 = vpop.xlane.xlu1 %351  ;;  %1426 = vmatprep.subr.bf16.mxu1 %v1551_v30  ;;  %v1557_v37 = vld [vmem:[#allocation6 + $0x94] ss:$12 sps:$4 sm:$0xff]  }
  0xf6   : > { %v376_v44 = vmul.f32 0.0078125, %v350_v42  ;;  %v406_v45 = vmul.f32 %v2007_v39, %v2007_v39  ;;  %v377_v46 = vmul.f32 0.0078125, %v352_v43  ;;  %v407_v49 = vmul.f32 %v2009_v40, %v2009_v40  ;;  %v1559_v38 = vld [vmem:[#allocation6 + $0x80] ss:$12 sps:$4 sm:$0xff]   ;;  %v1563_v43 = vld [vmem:[#allocation6 + $0x98] ss:$12 sps:$4 sm:$0xff]  }
  0xf7   : > { %1427 = vmatpush3.bf16.msra.mxu1 %v1551_v30  ;;  %v1561_v42 = vld [vmem:[#allocation6 + $0xac] ss:$12 sps:$4 sm:$0xff]  }
  0xf8   : > { %v2015_v47 = vsub.f32 %v327_v6, %v376_v44  ;;  %424 = vadd.xlane.f32.xlu1 %v405_v41  ;;  %426 = vadd.xlane.f32.xlu0 %v406_v45  ;;  %v2018_v48 = vsub.f32 %v1958_v7, %v377_v46  ;;  %v1544_v7 = vld [vmem:[#allocation6 + $0x30] ss:$12 sps:$4 sm:$0xff]   ;;  %v1564_v44 = vld [vmem:[#allocation6 + $0xa8] ss:$12 sps:$4 sm:$0xff]   ;;  %v1750_v46 = vmov 0  }
  0xf9   : > { %v354_v50 = vpop.xlane.xlu0 %353  ;;  %v356_v51 = vpop.xlane.xlu1 %355  ;;  %766 = vmatpush1.bf16.msra.mxu0 %v1544_v7  ;;  %1428 = vmatprep.subr.bf16.mxu1 %v1555_v35  ;;  %v1560_v41 = vld [vmem:[#allocation6 + $0x90] ss:$12 sps:$4 sm:$0xff]  }
  0xfa   : > { %v378_v52 = vmul.f32 0.0078125, %v354_v50  ;;  %v408_v53 = vmul.f32 %v2015_v47, %v2015_v47  ;;  %v379_v54 = vmul.f32 0.0078125, %v356_v51  ;;  %v409_v57 = vmul.f32 %v2018_v48, %v2018_v48  ;;  %767 = vmatprep.subr.bf16.mxu0 %v1545_v18  ;;  %v1565_v45 = vld [vmem:[#allocation6 + $0xb0] ss:$12 sps:$4 sm:$0xff]   ;;  %793 = vmatprep.mubr.bf16.mxu0 %v1750_v46 }
  0xfb   : > { %1429 = vmatpush3.bf16.msra.mxu1 %v1555_v35 }
  0xfc   : > { %v2025_v55 = vsub.f32 %v1961_v8, %v378_v52  ;;  %428 = vadd.xlane.f32.xlu1 %v407_v49  ;;  %430 = vadd.xlane.f32.xlu0 %v408_v53  ;;  %v2028_v56 = vsub.f32 %v1964_v9, %v379_v54 }
  0xfd   : > { %v358_v59 = vpop.xlane.xlu0 %357  ;;  %v360_v60 = vpop.xlane.xlu1 %359  ;;  %768 = vmatpush1.bf16.msra.mxu0 %v1548_v22  ;;  %1430 = vmatprep.subr.bf16.mxu1 %v1559_v38  ;;  %v2071_v22 = vld [vmem:[%s2281_s1] ss:$0 sm:$0xff] }
  0xfe   : > { %v380_v61 = vmul.f32 0.0078125, %v358_v59  ;;  %v410_v62 = vmul.f32 %v2025_v55, %v2025_v55  ;;  %v381_v63 = vmul.f32 0.0078125, %v360_v60  ;;  %v411_v4 = vmul.f32 %v2028_v56, %v2028_v56  ;;  %769 = vmatprep.subr.bf16.mxu0 %v1549_v29 }
  0xff   : > { %1431 = vmatpush3.bf16.msra.mxu1 %v1559_v38 }
 0x100   : > { %v2035_v2 = vsub.f32 %v1970_v10, %v380_v61  ;;  %432 = vadd.xlane.f32.xlu1 %v409_v57  ;;  %434 = vadd.xlane.f32.xlu0 %v410_v62  ;;  %v2038_v3 = vsub.f32 %v1973_v11, %v381_v63 }
 0x101   : > { %v362_v5 = vpop.xlane.xlu0 %361  ;;  %v364_v6 = vpop.xlane.xlu1 %363  ;;  %770 = vmatpush1.bf16.msra.mxu0 %v1552_v33  ;;  %1432 = vmatprep.subr.bf16.mxu1 %v1563_v43 }
 0x102   : > { %v382_v8 = vmul.f32 0.0078125, %v362_v5  ;;  %v412_v9 = vmul.f32 %v2035_v2, %v2035_v2  ;;  %v383_v16 = vmul.f32 0.0078125, %v364_v6  ;;  %v413_v17 = vmul.f32 %v2038_v3, %v2038_v3 }
 0x103   : > { %1433 = vmatpush3.bf16.msra.mxu1 %v1563_v43 }
 0x104   : > { %v2045_v10 = vsub.f32 %v1978_v12, %v382_v8  ;;  %436 = vadd.xlane.f32.xlu1 %v411_v4  ;;  %438 = vadd.xlane.f32.xlu0 %v412_v9  ;;  %v2048_v11 = vsub.f32 %v1981_v13, %v383_v16 }
 0x105   : > { %v366_v20 = vpop.xlane.xlu0 %365  ;;  %v368_v21 = vpop.xlane.xlu1 %367  ;;  %1434 = vmatprep.subr.bf16.mxu1 %v1565_v45 }
 0x106   : > { %v384_v23 = vmul.f32 0.0078125, %v366_v20  ;;  %v414_v26 = vmul.f32 %v2045_v10, %v2045_v10  ;;  %v385_v27 = vmul.f32 0.0078125, %v368_v21  ;;  %v415_v28 = vmul.f32 %v2048_v11, %v2048_v11 }
 0x107   : > { %1435 = vmatpush3.bf16.msra.mxu1 %v1565_v45 }
 0x108   : > { %v2055_v12 = vsub.f32 %v1986_v14, %v384_v23  ;;  %440 = vadd.xlane.f32.xlu1 %v413_v17  ;;  %442 = vadd.xlane.f32.xlu0 %v414_v26  ;;  %v2058_v13 = vsub.f32 %v1989_v15, %v385_v27  ;;  %v1553_v15 = vld [vmem:[#allocation6 + $0x7c] ss:$12 sps:$4 sm:$0xff]  }
 0x109   : > { %771 = vmatprep.subr.bf16.mxu0 %v1553_v15  ;;  %v2078_v15 = vld [vmem:[%s2282_s2] ss:$0 sm:$0xff] }
 0x10a   : > { %v416_v34 = vmul.f32 %v2055_v12, %v2055_v12  ;;  %v417_v14 = vmul.f32 %v2058_v13, %v2058_v13  ;;  %772 = vmatpush1.bf16.msra.mxu0 %v1556_v36 }
 0x10b   : > { %773 = vmatprep.subr.bf16.mxu0 %v1557_v37 }
 0x10c   : > { %444 = vadd.xlane.f32.xlu1 %v415_v28  ;;  %446 = vadd.xlane.f32.xlu0 %v416_v34 }
 0x10e   : > { %774 = vmatpush1.bf16.msra.mxu0 %v1560_v41 }
 0x10f   : > { %775 = vmatprep.subr.bf16.mxu0 %v1561_v42 }
 0x110   : > { %448 = vadd.xlane.f32.xlu1 %v417_v14 }
 0x112   : > { %776 = vmatpush1.bf16.msra.mxu0 %v1564_v44 }
 0x17d   : > { %v419_v49 = vpop.xlane.xlu0 %418 }
 0x17e   : > { %v450_v50 = vmul.f32 0.0078125, %v419_v49 }
 0x180   : > { %v466_v51 = vadd.f32 1e-05, %v450_v50 }
 0x181   : > { %v421_v52 = vpop.xlane.xlu1 %420  ;;  %v423_v53 = vpop.xlane.xlu0 %422 }
 0x182   : > { %1566 = vrsqrt.f32 %v466_v51  ;;  %v451_v54 = vmul.f32 0.0078125, %v421_v52  ;;  %v452_v57 = vmul.f32 0.0078125, %v423_v53 }
 0x184   : > { %v467_v58 = vadd.f32 1e-05, %v451_v54  ;;  %v468_v59 = vadd.f32 1e-05, %v452_v57 }
 0x185   : > { %v425_v60 = vpop.xlane.xlu1 %424  ;;  %v427_v61 = vpop.xlane.xlu0 %426 }
 0x186   : > { %1568 = vrsqrt.f32 %v467_v58  ;;  %v453_v62 = vmul.f32 0.0078125, %v425_v60  ;;  %v454_v63 = vmul.f32 0.0078125, %v427_v61 }
 0x187   : > { %1570 = vrsqrt.f32 %v468_v59 }
 0x188   : > { %v469_v0 = vadd.f32 1e-05, %v453_v62  ;;  %v470_v1 = vadd.f32 1e-05, %v454_v63 }
 0x189   : > { %v429_v4 = vpop.xlane.xlu1 %428  ;;  %v431_v5 = vpop.xlane.xlu0 %430 }
 0x18a   : > { %1572 = vrsqrt.f32 %v469_v0  ;;  %v455_v6 = vmul.f32 0.0078125, %v429_v4  ;;  %v456_v7 = vmul.f32 0.0078125, %v431_v5 }
 0x18b   : > { %1574 = vrsqrt.f32 %v470_v1 }
 0x18c   : > { %v1567_v8 = vpop.eup %1566  ;;  %v471_v9 = vadd.f32 1e-05, %v455_v6  ;;  %v472_v16 = vadd.f32 1e-05, %v456_v7 }
 0x18d   : > { %v433_v17 = vpop.xlane.xlu1 %432  ;;  %v435_v18 = vpop.xlane.xlu0 %434  ;;  %v498_v19 = vmul.f32 %v1567_v8, %v1993_v24 }
 0x18e   : > { %1576 = vrsqrt.f32 %v471_v9  ;;  %v457_v20 = vmul.f32 0.0078125, %v433_v17  ;;  %v458_v21 = vmul.f32 0.0078125, %v435_v18 }
 0x18f   : > { %1578 = vrsqrt.f32 %v472_v16  ;;  %v521_v34 = vmul.f32 %v2071_v22, %v498_v19 }
 0x190   : > { %v1569_v23 = vpop.eup %1568  ;;  %v473_v26 = vadd.f32 1e-05, %v457_v20  ;;  %v474_v27 = vadd.f32 1e-05, %v458_v21 }
 0x191   : > { %v1571_v28 = vpop.eup %1570  ;;  %v437_v29 = vpop.xlane.xlu1 %436  ;;  %v499_v33 = vmul.f32 %v1569_v23, %v1999_v31  ;;  %v544_v45 = vadd.f32 %v2078_v15, %v521_v34 }
 0x192   : > { %v439_v30 = vpop.xlane.xlu0 %438  ;;  %1580 = vrsqrt.f32 %v473_v26  ;;  %v459_v24 = vmul.f32 0.0078125, %v437_v29  ;;  %v500_v35 = vmul.f32 %v1571_v28, %v1995_v25 }
 0x193   : > { %v460_v14 = vmul.f32 0.0078125, %v439_v30  ;;  %1582 = vrsqrt.f32 %v474_v27  ;;  %v522_v36 = vmul.f32 %v2071_v22, %v499_v33 }
 0x194   : > { %v1573_v37 = vpop.eup %1572  ;;  %v475_v38 = vadd.f32 1e-05, %v459_v24  ;;  %v523_v31 = vmul.f32 %v2071_v22, %v500_v35 }
 0x195   : > { %v476_v41 = vadd.f32 1e-05, %v460_v14  ;;  %v1575_v42 = vpop.eup %1574  ;;  %v441_v43 = vpop.xlane.xlu1 %440  ;;  %v545_v49 = vadd.f32 %v2078_v15, %v522_v36  ;;  %v501_v50 = vmul.f32 %v1573_v37, %v2001_v32 }
 0x196   : > { %v443_v44 = vpop.xlane.xlu0 %442  ;;  %1584 = vrsqrt.f32 %v475_v38  ;;  %v461_v51 = vmul.f32 0.0078125, %v441_v43  ;;  %v502_v54 = vmul.f32 %v1575_v42, %v2007_v39  ;;  %v546_v60 = vadd.f32 %v2078_v15, %v523_v31 }
 0x197   : > { %v462_v25 = vmul.f32 0.0078125, %v443_v44  ;;  %1586 = vrsqrt.f32 %v476_v41  ;;  %v560_v52 = vpack.c.bf16 %v545_v49, %v544_v45  ;;  %v524_v53 = vmul.f32 %v2071_v22, %v501_v50 }
 0x198   : > { %v1577_v57 = vpop.eup %1576  ;;  %v477_v58 = vadd.f32 1e-05, %v461_v51  ;;  %v525_v1 = vmul.f32 %v2071_v22, %v502_v54 }
 0x199   : > { %v478_v59 = vadd.f32 1e-05, %v462_v25  ;;  %v1579_v61 = vpop.eup %1578  ;;  %v445_v62 = vpop.xlane.xlu1 %444  ;;  %794 = vmatmul.mubr.bf16.vlgmr.msra.gmra.mrb[0].mxu0 %v560_v52  ;;  %1436 = vmatprep.mubr.bf16.mxu1 %v560_v52  ;;  %v547_v32 = vadd.f32 %v2078_v15, %v524_v53  ;;  %v503_v0 = vmul.f32 %v1577_v57, %v2009_v40 }
 0x19a   : > { %v447_v63 = vpop.xlane.xlu0 %446  ;;  %1588 = vrsqrt.f32 %v477_v58  ;;  %v463_v4 = vmul.f32 0.0078125, %v445_v62  ;;  %803 = vmatprep.mubr.bf16.mxu0 %v1750_v46  ;;  %v504_v39 = vmul.f32 %v1579_v61, %v2015_v47  ;;  %v548_v19 = vadd.f32 %v2078_v15, %v525_v1 }
 0x19b   : > { %v464_v5 = vmul.f32 0.0078125, %v447_v63  ;;  %1590 = vrsqrt.f32 %v478_v59  ;;  %v561_v6 = vpack.c.bf16 %v547_v32, %v546_v60  ;;  %v526_v7 = vmul.f32 %v2071_v22, %v503_v0 }
 0x19c   : > { %v1581_v8 = vpop.eup %1580  ;;  %v479_v9 = vadd.f32 1e-05, %v463_v4  ;;  %v527_v17 = vmul.f32 %v2071_v22, %v504_v39 }
 0x19d   : > { %v480_v16 = vadd.f32 1e-05, %v464_v5  ;;  %v1583_v18 = vpop.eup %1582  ;;  %v449_v40 = vpop.xlane.xlu1 %448  ;;  %1437 = vmatmul.mubr.bf16.vlgmr.msra.gmra.mrb[0].mxu1 %v561_v6  ;;  %v549_v20 = vadd.f32 %v2078_v15, %v526_v7  ;;  %v505_v21 = vmul.f32 %v1581_v8, %v2018_v48 }
 0x19e   : > { %1592 = vrsqrt.f32 %v479_v9  ;;  %v465_v47 = vmul.f32 0.0078125, %v449_v40  ;;  %v506_v23 = vmul.f32 %v1583_v18, %v2025_v55  ;;  %v550_v30 = vadd.f32 %v2078_v15, %v527_v17 }
 0x19f   : > { %1594 = vrsqrt.f32 %v480_v16  ;;  %v562_v26 = vpack.c.bf16 %v549_v20, %v548_v19  ;;  %v528_v27 = vmul.f32 %v2071_v22, %v505_v21 }
 0x1a0   : > { %v1585_v28 = vpop.eup %1584  ;;  %v481_v29 = vadd.f32 1e-05, %v465_v47  ;;  %v529_v48 = vmul.f32 %v2071_v22, %v506_v23 }
 0x1a1   : > { %v1587_v33 = vpop.eup %1586  ;;  %804 = vmatmul.mubr.bf16.gmra.mrb[4].mxu0 %v561_v6  ;;  %1440 = vmatprep.mubr.bf16.mxu1 %v562_v26  ;;  %v551_v34 = vadd.f32 %v2078_v15, %v528_v27  ;;  %v507_v24 = vmul.f32 %v1585_v28, %v2028_v56 }
 0x1a2   : > { %1596 = vrsqrt.f32 %v481_v29  ;;  %813 = vmatprep.mubr.bf16.mxu0 %v1750_v46  ;;  %v508_v55 = vmul.f32 %v1587_v33, %v2035_v2  ;;  %v552_v41 = vadd.f32 %v2078_v15, %v529_v48 }
 0x1a3   : > { %v563_v14 = vpack.c.bf16 %v551_v34, %v550_v30  ;;  %v530_v35 = vmul.f32 %v2071_v22, %v507_v24 }
 0x1a4   : > { %v1589_v36 = vpop.eup %1588  ;;  %v531_v37 = vmul.f32 %v2071_v22, %v508_v55 }
 0x1a5   : > { %v1591_v38 = vpop.eup %1590  ;;  %1441 = vmatmul.mubr.bf16.gmra.mrb[4].mxu1 %v563_v14  ;;  %v553_v31 = vadd.f32 %v2078_v15, %v530_v35  ;;  %v509_v56 = vmul.f32 %v1589_v36, %v2038_v3 }
 0x1a6   : > { %v510_v42 = vmul.f32 %v1591_v38, %v2045_v10  ;;  %v554_v45 = vadd.f32 %v2078_v15, %v531_v37 }
 0x1a7   : > { %v564_v43 = vpack.c.bf16 %v553_v31, %v552_v41  ;;  %v532_v44 = vmul.f32 %v2071_v22, %v509_v56 }
 0x1a8   : > { %v1593_v2 = vpop.eup %1592  ;;  %v533_v25 = vmul.f32 %v2071_v22, %v510_v42 }
 0x1a9   : > { %v1595_v49 = vpop.eup %1594  ;;  %814 = vmatmul.mubr.bf16.gmra.mrb[8].mxu0 %v562_v26  ;;  %1444 = vmatprep.mubr.bf16.mxu1 %v564_v43  ;;  %v555_v50 = vadd.f32 %v2078_v15, %v532_v44  ;;  %v511_v51 = vmul.f32 %v1593_v2, %v2048_v11 }
 0x1aa   : > { %823 = vmatprep.mubr.bf16.mxu0 %v1750_v46  ;;  %v512_v3 = vmul.f32 %v1595_v49, %v2055_v12  ;;  %v556_v54 = vadd.f32 %v2078_v15, %v533_v25 }
 0x1ab   : > { %v565_v10 = vpack.c.bf16 %v555_v50, %v554_v45  ;;  %v534_v52 = vmul.f32 %v2071_v22, %v511_v51 }
 0x1ac   : > { %v1597_v53 = vpop.eup %1596  ;;  %v535_v59 = vmul.f32 %v2071_v22, %v512_v3 }
 0x1ad   : > { %1445 = vmatmul.mubr.bf16.gmra.mrb[8].mxu1 %v565_v10  ;;  %v557_v57 = vadd.f32 %v2078_v15, %v534_v52  ;;  %v513_v58 = vmul.f32 %v1597_v53, %v2058_v13  ;;  %v618_v13 = vlaneseq }
 0x1ae   : > { %v558_v12 = vadd.f32 %v2078_v15, %v535_v59 }
 0x1af   : > { %v566_v11 = vpack.c.bf16 %v557_v57, %v556_v54  ;;  %v536_v60 = vmul.f32 %v2071_v22, %v513_v58  ;;  %v619_v22 = vshrl.u32 %v618_v13, 7 }
 0x1b1   : > { %824 = vmatmul.mubr.bf16.gmra.mrb[12].mxu0 %v563_v14  ;;  %1448 = vmatprep.mubr.bf16.mxu1 %v566_v11  ;;  %v559_v61 = vadd.f32 %v2078_v15, %v536_v60  ;;  %v620_v63 = vsub.s32 0, %v619_v22  ;;  %v616_v15 = vld [vmem:[%s2284_s4] sm:$0x7]  ;;  %v624_v32 = vsub.s32 1, %v619_v22  ;;  %v628_v1 = vsub.s32 2, %v619_v22 }
 0x1b2   : > { %833 = vmatprep.mubr.bf16.mxu0 %v1750_v46 }
 0x1b3   : > { %v567_v62 = vpack.c.bf16 %v559_v61, %v558_v12  ;;  %v2135_v0 = vrot.slane %v616_v15, %v620_v63  ;;  %v2137_v4 = vrot.slane %v616_v15, %v624_v32 }
 0x1b5   : > { %1449 = vmatmul.mubr.bf16.gmra.mrb[12].mxu1 %v567_v62 }
 0x1b9   : > { %834 = vmatmul.mubr.bf16.gmra.mrb[16].mxu0 %v564_v43 }
 0x1ba   : > { %843 = vmatprep.mubr.bf16.mxu0 %v1750_v46 }
 0x1c1   : > { %844 = vmatmul.mubr.bf16.gmra.mrb[20].mxu0 %v565_v10 }
 0x1c2   : > { %853 = vmatprep.mubr.bf16.mxu0 %v1750_v46 }
 0x1c9   : > { %854 = vmatmul.mubr.bf16.gmra.mrb[24].mxu0 %v566_v11 }
 0x1ca   : > { %863 = vmatprep.mubr.bf16.mxu0 %v1750_v46  ;;  %v2141_v46 = vrot.slane %v616_v15, %v628_v1 }
 0x1d1   : > { %864 = vmatmul.mubr.bf16.gmra.mrb[28].mxu0 %v567_v62 }
 0x26c   : > { %v795_v5 = vpop.f32.mrb[0].mxu0 }
 0x26d   : > { %v796_v39 = vadd.f32 %v795_v5, %v2135_v0  ;;  %v797_v6 = vpop.f32.mrb[1].mxu0 }
 0x26e   : > { %v798_v7 = vadd.f32 %v797_v6, %v2137_v4  ;;  %v799_v8 = vpop.f32.mrb[2].mxu0 }
 0x26f   : > { %v800_v9 = vadd.f32 %v799_v8, %v2135_v0  ;;  %v801_v16 = vpop.f32.mrb[3].mxu0 }
 0x270   : > { %v1372_v17 = vpack.c.bf16 %v798_v7, %v796_v39  ;;  %v802_v18 = vadd.f32 %v801_v16, %v2137_v4  ;;  %v1438_v40 = vpop.f32.mrb[0].mxu1 }
 0x271   : > { %v917_v19 = vadd.f32 %v1438_v40, %v2141_v46  ;;  %v908_v20 = vpop.f32.mrb[1].mxu1 }
 0x272   : > { %1131 = vst [vmem:[%s2147_s14] sm:$0xff] %v1372_v17  ;;  %v1374_v21 = vpack.c.bf16 %v802_v18, %v800_v9  ;;  %v909_v47 = vadd.f32 %v908_v20, %v2141_v46  ;;  %v1439_v23 = vpop.f32.mrb[2].mxu1 }
 0x273   : > { %v1377_v26 = vpack.c.bf16 %v917_v19, %v917_v19  ;;  %v920_v27 = vadd.f32 %v1439_v23, %v2141_v46  ;;  %v911_v28 = vpop.f32.mrb[3].mxu1 }
 0x274   : > { %1133 = vst [vmem:[%s2147_s14 + $0xc] sm:$0xff] %v1374_v21  ;;  %v1373_v29 = vpack.c.bf16 %v909_v47, %v909_v47  ;;  %v912_v30 = vadd.f32 %v911_v28, %v2141_v46  ;;  %v805_v33 = vpop.f32.mrb[4].mxu0 }
 0x275   : > { %1136 = vst [vmem:[%s2147_s14 + $0x20] sm:$0xf] %v1377_v26  ;;  %v1379_v34 = vpack.c.bf16 %v920_v27, %v920_v27  ;;  %v806_v24 = vadd.f32 %v805_v33, %v2135_v0  ;;  %v807_v48 = vpop.f32.mrb[5].mxu0 }
 0x276   : > { %1132 = vst [vmem:[%s2147_s14 + $0x8] sm:$0xf] %v1373_v29  ;;  %v1375_v55 = vpack.c.bf16 %v912_v30, %v912_v30  ;;  %v808_v14 = vadd.f32 %v807_v48, %v2137_v4  ;;  %v809_v35 = vpop.f32.mrb[6].mxu0 }
 0x277   : > { %1138 = vst [vmem:[%s2147_s14 + $0x2c] sm:$0xf] %v1379_v34  ;;  %v810_v36 = vadd.f32 %v809_v35, %v2135_v0  ;;  %v811_v37 = vpop.f32.mrb[7].mxu0 }
 0x278   : > { %1134 = vst [vmem:[%s2147_s14 + $0x14] sm:$0xf] %v1375_v55  ;;  %v1376_v38 = vpack.c.bf16 %v808_v14, %v806_v24  ;;  %v812_v41 = vadd.f32 %v811_v37, %v2137_v4  ;;  %v1442_v31 = vpop.f32.mrb[4].mxu1 }
 0x279   : > { %v933_v56 = vadd.f32 %v1442_v31, %v2141_v46  ;;  %v924_v42 = vpop.f32.mrb[5].mxu1 }
 0x27a   : > { %1135 = vst [vmem:[%s2147_s14 + $0x18] sm:$0xff] %v1376_v38  ;;  %v1378_v43 = vpack.c.bf16 %v812_v41, %v810_v36  ;;  %v925_v44 = vadd.f32 %v924_v42, %v2141_v46  ;;  %v1443_v2 = vpop.f32.mrb[6].mxu1 }
 0x27b   : > { %v1385_v45 = vpack.c.bf16 %v933_v56, %v933_v56  ;;  %v936_v49 = vadd.f32 %v1443_v2, %v2141_v46  ;;  %v927_v50 = vpop.f32.mrb[7].mxu1 }
 0x27c   : > { %1137 = vst [vmem:[%s2147_s14 + $0x24] sm:$0xff] %v1378_v43  ;;  %v1381_v51 = vpack.c.bf16 %v925_v44, %v925_v44  ;;  %v928_v25 = vadd.f32 %v927_v50, %v2141_v46  ;;  %v815_v3 = vpop.f32.mrb[8].mxu0 }
 0x27d   : > { %1144 = vst [vmem:[%s2147_s14 + $0x50] sm:$0xf] %v1385_v45  ;;  %v1387_v10 = vpack.c.bf16 %v936_v49, %v936_v49  ;;  %v816_v52 = vadd.f32 %v815_v3, %v2135_v0  ;;  %v817_v53 = vpop.f32.mrb[9].mxu0 }
 0x27e   : > { %1140 = vst [vmem:[%s2147_s14 + $0x38] sm:$0xf] %v1381_v51  ;;  %v1383_v54 = vpack.c.bf16 %v928_v25, %v928_v25  ;;  %v818_v57 = vadd.f32 %v817_v53, %v2137_v4  ;;  %v819_v58 = vpop.f32.mrb[10].mxu0 }
 0x27f   : > { %1146 = vst [vmem:[%s2147_s14 + $0x5c] sm:$0xf] %v1387_v10  ;;  %v820_v59 = vadd.f32 %v819_v58, %v2135_v0  ;;  %v821_v11 = vpop.f32.mrb[11].mxu0 }
 0x280   : > { %1142 = vst [vmem:[%s2147_s14 + $0x44] sm:$0xf] %v1383_v54  ;;  %v1380_v60 = vpack.c.bf16 %v818_v57, %v816_v52  ;;  %v822_v12 = vadd.f32 %v821_v11, %v2137_v4  ;;  %v1446_v61 = vpop.f32.mrb[8].mxu1 }
 0x281   : > { %v949_v62 = vadd.f32 %v1446_v61, %v2141_v46  ;;  %v940_v13 = vpop.f32.mrb[9].mxu1 }
 0x282   : > { %1139 = vst [vmem:[%s2147_s14 + $0x30] sm:$0xff] %v1380_v60  ;;  %v1382_v22 = vpack.c.bf16 %v822_v12, %v820_v59  ;;  %v941_v63 = vadd.f32 %v940_v13, %v2141_v46  ;;  %v1447_v15 = vpop.f32.mrb[10].mxu1 }
 0x283   : > { %v1393_v32 = vpack.c.bf16 %v949_v62, %v949_v62  ;;  %v952_v1 = vadd.f32 %v1447_v15, %v2141_v46  ;;  %v943_v5 = vpop.f32.mrb[11].mxu1 }
 0x284   : > { %1141 = vst [vmem:[%s2147_s14 + $0x3c] sm:$0xff] %v1382_v22  ;;  %v1389_v39 = vpack.c.bf16 %v941_v63, %v941_v63  ;;  %v944_v6 = vadd.f32 %v943_v5, %v2141_v46  ;;  %v825_v7 = vpop.f32.mrb[12].mxu0 }
 0x285   : > { %1152 = vst [vmem:[%s2147_s14 + $0x80] sm:$0xf] %v1393_v32  ;;  %v1395_v8 = vpack.c.bf16 %v952_v1, %v952_v1  ;;  %v826_v9 = vadd.f32 %v825_v7, %v2135_v0  ;;  %v827_v16 = vpop.f32.mrb[13].mxu0 }
 0x286   : > { %1148 = vst [vmem:[%s2147_s14 + $0x68] sm:$0xf] %v1389_v39  ;;  %v1391_v17 = vpack.c.bf16 %v944_v6, %v944_v6  ;;  %v828_v18 = vadd.f32 %v827_v16, %v2137_v4  ;;  %v829_v40 = vpop.f32.mrb[14].mxu0 }
 0x287   : > { %1154 = vst [vmem:[%s2147_s14 + $0x8c] sm:$0xf] %v1395_v8  ;;  %v830_v19 = vadd.f32 %v829_v40, %v2135_v0  ;;  %v831_v20 = vpop.f32.mrb[15].mxu0 }
 0x288   : > { %1150 = vst [vmem:[%s2147_s14 + $0x74] sm:$0xf] %v1391_v17  ;;  %v1384_v21 = vpack.c.bf16 %v828_v18, %v826_v9  ;;  %v832_v47 = vadd.f32 %v831_v20, %v2137_v4  ;;  %v1450_v23 = vpop.f32.mrb[12].mxu1 }
 0x289   : > { %v965_v26 = vadd.f32 %v1450_v23, %v2141_v46  ;;  %v956_v27 = vpop.f32.mrb[13].mxu1 }
 0x28a   : > { %1143 = vst [vmem:[%s2147_s14 + $0x48] sm:$0xff] %v1384_v21  ;;  %v1386_v28 = vpack.c.bf16 %v832_v47, %v830_v19  ;;  %v957_v29 = vadd.f32 %v956_v27, %v2141_v46  ;;  %v1451_v30 = vpop.f32.mrb[14].mxu1 }
 0x28b   : > { %v1401_v33 = vpack.c.bf16 %v965_v26, %v965_v26  ;;  %v968_v34 = vadd.f32 %v1451_v30, %v2141_v46  ;;  %v959_v24 = vpop.f32.mrb[15].mxu1 }
 0x28c   : > { %1145 = vst [vmem:[%s2147_s14 + $0x54] sm:$0xff] %v1386_v28  ;;  %v1397_v48 = vpack.c.bf16 %v957_v29, %v957_v29  ;;  %v960_v55 = vadd.f32 %v959_v24, %v2141_v46  ;;  %v835_v14 = vpop.f32.mrb[16].mxu0 }
 0x28d   : > { %1160 = vst [vmem:[%s2147_s14 + $0xb0] sm:$0xf] %v1401_v33  ;;  %v1403_v35 = vpack.c.bf16 %v968_v34, %v968_v34  ;;  %v836_v36 = vadd.f32 %v835_v14, %v2135_v0  ;;  %v837_v37 = vpop.f32.mrb[17].mxu0 }
 0x28e   : > { %1156 = vst [vmem:[%s2147_s14 + $0x98] sm:$0xf] %v1397_v48  ;;  %v1399_v38 = vpack.c.bf16 %v960_v55, %v960_v55  ;;  %v838_v41 = vadd.f32 %v837_v37, %v2137_v4  ;;  %v839_v31 = vpop.f32.mrb[18].mxu0 }
 0x28f   : > { %1162 = vst [vmem:[%s2147_s14 + $0xbc] sm:$0xf] %v1403_v35  ;;  %v840_v56 = vadd.f32 %v839_v31, %v2135_v0  ;;  %v841_v42 = vpop.f32.mrb[19].mxu0 }
 0x290   : > { %1158 = vst [vmem:[%s2147_s14 + $0xa4] sm:$0xf] %v1399_v38  ;;  %v1388_v46 = vpack.c.bf16 %v838_v41, %v836_v36  ;;  %v842_v43 = vadd.f32 %v841_v42, %v2137_v4 }
 0x292   : > { %1147 = vst [vmem:[%s2147_s14 + $0x60] sm:$0xff] %v1388_v46  ;;  %v1390_v44 = vpack.c.bf16 %v842_v43, %v840_v56 }
 0x294   : > { %1149 = vst [vmem:[%s2147_s14 + $0x6c] sm:$0xff] %v1390_v44  ;;  %v845_v2 = vpop.f32.mrb[20].mxu0 }
 0x295   : > { %v846_v45 = vadd.f32 %v845_v2, %v2135_v0  ;;  %v847_v49 = vpop.f32.mrb[21].mxu0 }
 0x296   : > { %v848_v50 = vadd.f32 %v847_v49, %v2137_v4  ;;  %v849_v51 = vpop.f32.mrb[22].mxu0 }
 0x297   : > { %v850_v25 = vadd.f32 %v849_v51, %v2135_v0  ;;  %v851_v3 = vpop.f32.mrb[23].mxu0 }
 0x298   : > { %v1392_v10 = vpack.c.bf16 %v848_v50, %v846_v45  ;;  %v852_v52 = vadd.f32 %v851_v3, %v2137_v4 }
 0x29a   : > { %1151 = vst [vmem:[%s2147_s14 + $0x78] sm:$0xff] %v1392_v10  ;;  %v1394_v53 = vpack.c.bf16 %v852_v52, %v850_v25 }
 0x29c   : > { %1153 = vst [vmem:[%s2147_s14 + $0x84] sm:$0xff] %v1394_v53  ;;  %v855_v54 = vpop.f32.mrb[24].mxu0 }
 0x29d   : > { %v856_v57 = vadd.f32 %v855_v54, %v2135_v0  ;;  %v857_v58 = vpop.f32.mrb[25].mxu0 }
 0x29e   : > { %v858_v59 = vadd.f32 %v857_v58, %v2137_v4  ;;  %v859_v11 = vpop.f32.mrb[26].mxu0 }
 0x29f   : > { %v860_v60 = vadd.f32 %v859_v11, %v2135_v0  ;;  %v861_v12 = vpop.f32.mrb[27].mxu0 }
 0x2a0   : > { %v1396_v61 = vpack.c.bf16 %v858_v59, %v856_v57  ;;  %v862_v62 = vadd.f32 %v861_v12, %v2137_v4 }
 0x2a2   : > { %1155 = vst [vmem:[%s2147_s14 + $0x90] sm:$0xff] %v1396_v61  ;;  %v1398_v13 = vpack.c.bf16 %v862_v62, %v860_v60 }
 0x2a4   : > { %1157 = vst [vmem:[%s2147_s14 + $0x9c] sm:$0xff] %v1398_v13  ;;  %v865_v22 = vpop.f32.mrb[28].mxu0 }
 0x2a5   : > { %v866_v63 = vadd.f32 %v865_v22, %v2135_v0  ;;  %v867_v15 = vpop.f32.mrb[29].mxu0 }
 0x2a6   : > { %v868_v32 = vadd.f32 %v867_v15, %v2137_v4  ;;  %v869_v1 = vpop.f32.mrb[30].mxu0 }
 0x2a7   : > { %v870_v5 = vadd.f32 %v869_v1, %v2135_v0  ;;  %v871_v39 = vpop.f32.mrb[31].mxu0 }
 0x2a8   : > { %v1400_v6 = vpack.c.bf16 %v868_v32, %v866_v63  ;;  %v872_v7 = vadd.f32 %v871_v39, %v2137_v4 }
 0x2aa   : > { %1159 = vst [vmem:[%s2147_s14 + $0xa8] sm:$0xff] %v1400_v6  ;;  %v1402_v8 = vpack.c.bf16 %v872_v7, %v870_v5 }
 0x2ac   : > { %1161 = vst [vmem:[%s2147_s14 + $0xb4] sm:$0xff] %v1402_v8 }
 0x2ad   : > { %1669 = shalt.err (!%p1666_p5)
}
 0x2ae   : > { %s1670_s25 = scalar_lea.hbm %s2227_s7, 3072  ;;  %s1674_s11 = scalar_lea.hbm %s2285_s5, 6144 }
 0x2af   : > { %p1671_p9 = scmp.ne.s32.totalorder %s2227_s7, %s1670_s25  ;;  %p1675_p3 = scmp.lt.u32.totalorder %s2227_s7, %s2285_s5 }
 0x2b0   : > { %p1676_p7 = scmp.lt.u32.totalorder %s1674_s11, %s1670_s25  ;;  %p1678_p4 = scmp.lt.u32.totalorder %s1670_s25, %s2227_s7 }
 0x2b1   : > { %p1672_p1 = pnand %p1671_p9, %p1880_p10 }
 0x2b2   : > { %p1677_p13 = por %p1676_p7, %p1675_p3 }
 0x2b3   : > { %p1673_p2 = pneg %p1672_p1 }
 0x2b4   : > { %p1679_p6 = por %p1678_p4, %p1677_p13 }
 0x2b6   : > { %p1680_p8 = pnand %p1679_p6, %p1673_p2 }
 0x2b8   : > { %1683 = shalt.err (!%p1680_p8)
}
 0x2b9   : > { %s1752_s12 = smov 192   ;;  %s1753_s24 = smov 12  }
 0x2ba   : > { %1460 = dma.vmem_to_hbm [thread:$0]  (%p1880_p10), %s2230_s8, 3072, %s2227_s7, %s1164_s21, %s1752_s12, %s1752_s12, %s1753_s24  }
 0x2bb PF: > { %s1197_s27 = sand.u32 1, %s1722_s18   ;;  %p2303_p12 = scmp.ne.s32.totalorder %s2293_s29, 0 }
 0x2bc   : > { %p2304_p11 = scmp.ge.s32.totalorder %s1742_s23, 2  ;;  %s1198_s26 = scalar_lea.sflag [#allocation5], %s1197_s27 }
 0x2be   : > { %p1471_p0 = pnand %p2304_p11, %p2303_p12 }
 0x2c0   : > { %1717 = dma.done.wait (!%p1471_p0), %s1198_s26, 3072  }
 0x2c1   : > { %1719 = vsyncadd (!%p1471_p0), %s1198_s26, 4294964224  ;;  %s22_s23 = sadd.s32 1, %s1742_s23   ;;  %s2305_s18 = smov %s1726_s19 }
 0x2c2   : > { %p19_p5 = scmp.ge.s32.totalorder %s22_s23, 4   ;;  %s2306_s19 = smov %s1730_s20 }
 0x2c3   : > { %s2307_s20 = smov %s1889_s15  ;;  %s2308_s21 = smov %s1738_s22 }
 0x2c4   : > { %s2309_s22 = smov %s2311_s9  ;;  %21 = sbr.rel (!%p19_p5) target bundleno = 7 (0x7), region = 97 }
 0x2cb   :  { %1203 = vsyncpa [#allocation4], 1 }
 0x2cc   :  { %1205 = vsyncpa [#allocation4 + $0x1], 1 }
 0x2cd   :  { %1206 = vsyncpa [#allocation7], 1 }
 0x2ce   :  { %1207 = vsyncpa [#allocation5], 1 }
 0x2cf   :  { %1209 = vsyncpa [#allocation5 + $0x1], 1 }

</bundles_post_ra>
